<compile_context>
chip_gen: v7x
topology: tpu7x:2x2x1
jax: 0.10.0
libtpu: 0.0.40
codegen_flags: <defaults>
</compile_context>

<pallas_src>
import functools
import math

import jax
import jax.numpy as jnp
from jax.experimental import pallas as pl
from jax.experimental.pallas import tpu as pltpu

_LANE = 128


def _round_up(v, m):
    return (v + m - 1) // m * m


def _gcn_fused_kernel(x_ref, w_ref, att_ref, b_ref, o_ref, *, batch, node_n,
                      att_first):
    # x_ref:   (B*N, Fin)   all batch elements stacked along rows
    # w_ref:   (Fin, Fp)    weight zero-padded to lane-dense Fp (multiple of 128)
    # att_ref: (N, N)
    # b_ref:   (1, Fp)      bias zero-padded to Fp
    # o_ref:   (B*N, Fp)    lane-dense output slab (sliced back to Fout outside)
    att = att_ref[...]
    bias = b_ref[...]

    if att_first:
        # (att @ x) @ W : cheaper when Fin < Fout (fewer FLOPs in the N*N matmul).
        mixed = jnp.concatenate(
            [jnp.dot(att, x_ref[b * node_n:(b + 1) * node_n, :],
                     preferred_element_type=jnp.float32)
             for b in range(batch)],
            axis=0)                                               # (B*N, Fin)
        out = jnp.dot(mixed, w_ref[...],
                      preferred_element_type=jnp.float32) + bias  # (B*N, Fp)
        o_ref[...] = out.astype(o_ref.dtype)
    else:
        # x @ W first as ONE big MXU matmul, then per-batch node mixing.
        support = jnp.dot(x_ref[...], w_ref[...],
                          preferred_element_type=jnp.float32)     # (B*N, Fp)
        for b in range(batch):  # batch is small & static; unrolled
            blk = support[b * node_n:(b + 1) * node_n, :]         # (N, Fp)
            out = jnp.dot(att, blk,
                          preferred_element_type=jnp.float32) + bias
            o_ref[b * node_n:(b + 1) * node_n, :] = out.astype(o_ref.dtype)


def graph_convolution(x, weight, att, bias=None):
    """x: (B, N, Fin); weight: (Fin, Fout); att: (N, N); bias: (Fout,) or None."""
    B, N, Fin = x.shape
    Fin_w, Fout = weight.shape
    assert Fin_w == Fin and att.shape == (N, N)

    # Lane-dense padding of the output/feature axis (unmasked 128-wide stores).
    Fp = _round_up(Fout, _LANE)
    w_pad = jnp.zeros((Fin, Fp), weight.dtype).at[:, :Fout].set(weight)
    if bias is None:
        b_pad = jnp.zeros((1, Fp), x.dtype)
    else:
        b_pad = jnp.zeros((1, Fp), bias.dtype).at[:, :Fout].set(bias)

    x2d = x.reshape(B * N, Fin)            # fold batch into the row dimension
    att_first = Fin < Fout                 # association rule (no-op when equal)

    kernel = functools.partial(_gcn_fused_kernel, batch=B, node_n=N,
                               att_first=att_first)

    vmem = pl.BlockSpec(memory_space=pltpu.MemorySpace.VMEM)
    out = pl.pallas_call(
        kernel,
        out_shape=jax.ShapeDtypeStruct((B * N, Fp), x.dtype),
        in_specs=[vmem, vmem, vmem, vmem],
        out_specs=vmem,
    )(x2d, w_pad, att, b_pad)

    return out[:, :Fout].reshape(B, N, Fout)


if __name__ == "__main__":
    # Module hyperparameters (consistent with GraphConvolution.__init__ defaults)
    in_features = 32
    out_features = 32
    node_n = 48
    batch = 2

    key = jax.random.PRNGKey(0)
    kx, kw, ka, kb = jax.random.split(key, 4)

    # Deterministic parameter init mirroring reset_parameters():
    # uniform(-stdv, stdv) with stdv = 1/sqrt(out_features)
    stdv = 1.0 / math.sqrt(out_features)
    weight = jax.random.uniform(kw, (in_features, out_features),
                                minval=-stdv, maxval=stdv, dtype=jnp.float32)
    att = jax.random.uniform(ka, (node_n, node_n),
                             minval=-stdv, maxval=stdv, dtype=jnp.float32)
    bias = jax.random.uniform(kb, (out_features,),
                              minval=-stdv, maxval=stdv, dtype=jnp.float32)

    x = jax.random.normal(kx, (batch, node_n, in_features), dtype=jnp.float32)

    out = graph_convolution(x, weight, att, bias)
    out = jax.block_until_ready(out)

    # Pure-JAX reference check (PyTorch forward semantics)
    ref = jnp.matmul(att, jnp.matmul(x, weight)) + bias
    assert out.shape == (batch, node_n, out_features)
    assert jnp.allclose(out, ref, atol=1e-5, rtol=1e-5)

    print("KERNEL_OK")
</pallas_src>

<mosaic_0001>
module attributes {stable_mosaic.version = 11 : i64} {
  func.func @_gcn_fused_kernel(%arg0: memref<96x32xf32, #tpu.memory_space<vmem>>, %arg1: memref<32x128xf32, #tpu.memory_space<vmem>>, %arg2: memref<48x48xf32, #tpu.memory_space<vmem>>, %arg3: memref<1x128xf32, #tpu.memory_space<vmem>>, %arg4: memref<96x128xf32, #tpu.memory_space<vmem>>) attributes {dimension_semantics = [], scalar_prefetch = 0 : i64, scratch_operands = 0 : i64, tpu.core_type = #tpu.core_type<tc>} {
    %c0 = arith.constant 0 : index
    %c0_0 = arith.constant 0 : index
    %0 = vector.load %arg2[%c0, %c0_0] : memref<48x48xf32, #tpu.memory_space<vmem>>, vector<48x48xf32>
    %c0_1 = arith.constant 0 : index
    %c0_2 = arith.constant 0 : index
    %1 = vector.load %arg3[%c0_1, %c0_2] : memref<1x128xf32, #tpu.memory_space<vmem>>, vector<1x128xf32>
    %c0_3 = arith.constant 0 : index
    %c0_4 = arith.constant 0 : index
    %2 = vector.load %arg0[%c0_3, %c0_4] : memref<96x32xf32, #tpu.memory_space<vmem>>, vector<96x32xf32>
    %c0_5 = arith.constant 0 : index
    %c0_6 = arith.constant 0 : index
    %3 = vector.load %arg1[%c0_5, %c0_6] : memref<32x128xf32, #tpu.memory_space<vmem>>, vector<32x128xf32>
    %cst = arith.constant dense<0.000000e+00> : vector<96x128xf32>
    %4 = tpu.matmul %2, %3, %cst {dimension_numbers = #tpu.dot_dimension_numbers<[1], [0], [0], [1], [0, 0, 1, 1], [], []>} : vector<96x32xf32>, vector<32x128xf32>, vector<96x128xf32> -> vector<96x128xf32>
    %5 = vector.extract_strided_slice %4 {offsets = [0, 0], sizes = [48, 128], strides = [1, 1]} : vector<96x128xf32> to vector<48x128xf32>
    %cst_7 = arith.constant dense<0.000000e+00> : vector<48x128xf32>
    %6 = tpu.matmul %0, %5, %cst_7 {dimension_numbers = #tpu.dot_dimension_numbers<[1], [0], [0], [1], [0, 0, 1, 1], [], []>} : vector<48x48xf32>, vector<48x128xf32>, vector<48x128xf32> -> vector<48x128xf32>
    %7 = vector.broadcast %1 : vector<1x128xf32> to vector<48x128xf32>
    %8 = arith.addf %6, %7 : vector<48x128xf32>
    %c0_8 = arith.constant 0 : index
    %c0_9 = arith.constant 0 : index
    %9 = vector.load %arg4[%c0_8, %c0_9] : memref<96x128xf32, #tpu.memory_space<vmem>>, vector<48x128xf32>
    tpu.vector_store %arg4[%c0_8, %c0_9], %8 {strides = array<i32>} : memref<96x128xf32, #tpu.memory_space<vmem>>, vector<48x128xf32>,
    %10 = vector.extract_strided_slice %4 {offsets = [48, 0], sizes = [48, 128], strides = [1, 1]} : vector<96x128xf32> to vector<48x128xf32>
    %cst_10 = arith.constant dense<0.000000e+00> : vector<48x128xf32>
    %11 = tpu.matmul %0, %10, %cst_10 {dimension_numbers = #tpu.dot_dimension_numbers<[1], [0], [0], [1], [0, 0, 1, 1], [], []>} : vector<48x48xf32>, vector<48x128xf32>, vector<48x128xf32> -> vector<48x128xf32>
    %12 = vector.broadcast %1 : vector<1x128xf32> to vector<48x128xf32>
    %13 = arith.addf %11, %12 : vector<48x128xf32>
    %c48 = arith.constant 48 : index
    %c0_11 = arith.constant 0 : index
    %14 = vector.load %arg4[%c48, %c0_11] : memref<96x128xf32, #tpu.memory_space<vmem>>, vector<48x128xf32>
    tpu.vector_store %arg4[%c48, %c0_11], %13 {strides = array<i32>} : memref<96x128xf32, #tpu.memory_space<vmem>>, vector<48x128xf32>,
    return
  }
}

</mosaic_0001>

<bundles_post_ra>
// kernel: tpu_custom_call.1
= control target key start
LH: loop header
LB: loop body
LE: loop exit
PB: predicated region body
PF: predicated region fallthrough
CT: control target
= control target key end

     0   :  { %vm41_vm0 = vcmask 261120   ;;  %s771_s0 = inlined_call_operand.vmem [shape: f32[96,32], index: 0, kind: input, shape index: {}]   ;;  %s772_s1 = inlined_call_operand.vmem [shape: f32[32,128], index: 1, kind: input, shape index: {}]   ;;  %s773_s2 = inlined_call_operand.vmem [shape: f32[48,48], index: 2, kind: input, shape index: {}]   ;;  %s774_s3 = inlined_call_operand.vmem [shape: f32[1,128], index: 3, kind: input, shape index: {}]   ;;  %s775_s4 = inlined_call_operand.hbm [shape: f32[96,128], index: 4, kind: output, shape index: {}]  }
   0x1   :  { %v37_v0 = vld [vmem:[%s772_s1] sm:$0xff]  ;;  %v38_v1 = vld [vmem:[%s772_s1 + $0x8] sm:$0xff]  ;;  %v39_v2 = vld [vmem:[%s772_s1 + $0x10] sm:$0xff] }
   0x2   :  { %v579_v3 = vpack.c.bf16 %v38_v1, %v37_v0  ;;  %v40_v4 = vld [vmem:[%s772_s1 + $0x18] sm:$0xff]  ;;  %v25_v5 = vld [vmem:[%s771_s0] sm:$0xff] }
   0x3   :  { %v583_v6 = vpack.c.bf16 %v40_v4, %v39_v2  ;;  %519 = vmatprep.mubr.msk.f32.mxu0 %vm41_vm0, %v25_v5 }
   0x4   :  { %580 = vmatprep.subr.bf16.mxu0 %v579_v3 }
   0x5   :  { %582 = vmatpush3.bf16.msra.mxu0 %v579_v3 }
   0x6   :  { %584 = vmatprep.subr.bf16.mxu0 %v583_v6 }
   0x7   :  { %9 = vsyncpa [#allocation3], 0  ;;  %v26_v7 = vld [vmem:[%s771_s0 + $0x8] sm:$0xff]  ;;  %v27_v8 = vld [vmem:[%s771_s0 + $0x10] sm:$0xff]  ;;  %vm209_vm1 = vcmask 392192  }
   0x8   :  { %v28_v9 = vld [vmem:[%s771_s0 + $0x18] sm:$0xff]  ;;  %v29_v10 = vld [vmem:[%s771_s0 + $0x20] sm:$0xff]  ;;  %v30_v11 = vld [vmem:[%s771_s0 + $0x28] sm:$0xff] }
   0x9   :  { %586 = vmatpush3.bf16.msra.mxu0 %v583_v6  ;;  %v31_v12 = vld [vmem:[%s771_s0 + $0x30] sm:$0xff]  ;;  %v32_v13 = vld [vmem:[%s771_s0 + $0x38] sm:$0xff]  ;;  %v33_v14 = vld [vmem:[%s771_s0 + $0x40] sm:$0xff] }
   0xa   :  { %v34_v15 = vld [vmem:[%s771_s0 + $0x48] sm:$0xff]  ;;  %v35_v16 = vld [vmem:[%s771_s0 + $0x50] sm:$0xff]  ;;  %v36_v17 = vld [vmem:[%s771_s0 + $0x58] sm:$0xff] }
   0xb   :  { %v18_v18 = vld [vmem:[%s773_s2] sm:$0xff]  ;;  %v19_v30 = vld [vmem:[%s773_s2 + $0x8] sm:$0xff]  ;;  %v20_v32 = vld [vmem:[%s773_s2 + $0x10] sm:$0xff] }
   0xc   :  { %520 = vmatmul.mubr.msk.f32.vlgmr.msra.gmra.mrb[0].mxu0 %vm41_vm0, %v26_v7  ;;  %549 = vmatprep.mubr.msk.f32.mxu1 %vm209_vm1, %v18_v18  ;;  %v21_v35 = vld [vmem:[%s773_s2 + $0x18] sm:$0xff]  ;;  %v22_v37 = vld [vmem:[%s773_s2 + $0x20] sm:$0xff]  ;;  %v23_v40 = vld [vmem:[%s773_s2 + $0x28] sm:$0xff]  ;;  %s638_s2 = smov [#allocation2]  }
   0xd   :  { %522 = vmatprep.mubr.msk.f32.mxu0 %vm41_vm0, %v27_v8  ;;  %v458_v42 = vld [vmem:[%s774_s3] ss:$0 sm:$0xff]  ;;  %s435_s3 = sshll.u32 %s638_s2, 4  ;;  %s436_s3 = int_to_ptr.vmem [resolvable:$true] %s435_s3 }
   0xe   :  { %s614_s6 = scalar_lea.vmem %s436_s3, 1536  ;;  %p619_p1 = scmp.lt.s32.totalorder %s436_s3, %s436_s3 }
   0xf   :  { %p615_p0 = scmp.ne.s32.totalorder %s436_s3, %s614_s6  ;;  %p620_p2 = scmp.lt.s32.totalorder %s614_s6, %s614_s6 }
  0x10   :  { %523 = vmatmul.mubr.msk.f32.gmra.mrb[2].mxu0 %vm41_vm0, %v28_v9 }
  0x11   :  { %525 = vmatprep.mubr.msk.f32.mxu0 %vm41_vm0, %v29_v10  ;;  %p621_p3 = por %p620_p2, %p619_p1 }
  0x13   :  { %p622_p4 = pnand %p621_p3, %p615_p0 }
  0x14   :  { %526 = vmatmul.mubr.msk.f32.gmra.mrb[4].mxu0 %vm41_vm0, %v30_v11 }
  0x15   :  { %528 = vmatprep.mubr.msk.f32.mxu0 %vm41_vm0, %v31_v12 }
  0x18   :  { %529 = vmatmul.mubr.msk.f32.gmra.mrb[6].mxu0 %vm41_vm0, %v32_v13 }
  0x19   :  { %531 = vmatprep.mubr.msk.f32.mxu0 %vm41_vm0, %v33_v14 }
  0x1c   :  { %532 = vmatmul.mubr.msk.f32.gmra.mrb[8].mxu0 %vm41_vm0, %v34_v15 }
  0x1d   :  { %534 = vmatprep.mubr.msk.f32.mxu0 %vm41_vm0, %v35_v16 }
  0x20   :  { %535 = vmatmul.mubr.msk.f32.gmra.mrb[10].mxu0 %vm41_vm0, %v36_v17 }
  0xdf   :  { %v521_v19 = vpop.f32.mrb[0].mxu0 }
  0xe0   :  { %v144_v20 = vpop.f32.mrb[1].mxu0 }
  0xe1   :  { %v587_v21 = vpack.c.bf16 %v521_v19, %v144_v20 }
  0xe3   :  { %v524_v22 = vpop.f32.mrb[2].mxu0  ;;  %588 = vmatprep.subr.bf16.mxu1 %v587_v21 }
  0xe4   :  { %v154_v23 = vpop.f32.mrb[3].mxu0  ;;  %590 = vmatpush3.bf16.msra.mxu1 %v587_v21 }
  0xe5   :  { %v591_v24 = vpack.c.bf16 %v524_v22, %v154_v23 }
  0xe7   :  { %v527_v25 = vpop.f32.mrb[4].mxu0  ;;  %592 = vmatprep.subr.bf16.mxu1 %v591_v24 }
  0xe8   :  { %v164_v26 = vpop.f32.mrb[5].mxu0  ;;  %594 = vmatpush3.bf16.msra.mxu1 %v591_v24 }
  0xe9   :  { %v595_v27 = vpack.c.bf16 %v527_v25, %v164_v26 }
  0xeb   :  { %v530_v28 = vpop.f32.mrb[6].mxu0  ;;  %596 = vmatprep.subr.bf16.mxu1 %v595_v27 }
  0xec   :  { %v174_v29 = vpop.f32.mrb[7].mxu0  ;;  %598 = vmatpush3.bf16.msra.mxu1 %v595_v27 }
  0xed   :  { %v599_v31 = vpack.c.bf16 %v530_v28, %v174_v29 }
  0xef   :  { %v533_v33 = vpop.f32.mrb[8].mxu0  ;;  %550 = vmatmul.mubr.msk.f32.vlgmr.msra.gmra.mrb[0].mxu1 %vm209_vm1, %v19_v30  ;;  %600 = vmatprep.subr.bf16.mxu1 %v599_v31 }
  0xf0   :  { %v184_v34 = vpop.f32.mrb[9].mxu0  ;;  %602 = vmatpush3.bf16.msra.mxu1 %v599_v31  ;;  %552 = vmatprep.mubr.msk.f32.mxu1 %vm209_vm1, %v20_v32 }
  0xf1   :  { %v603_v36 = vpack.c.bf16 %v533_v33, %v184_v34 }
  0xf3   :  { %v536_v38 = vpop.f32.mrb[10].mxu0  ;;  %553 = vmatmul.mubr.msk.f32.gmra.mrb[2].mxu1 %vm209_vm1, %v21_v35  ;;  %604 = vmatprep.subr.bf16.mxu1 %v603_v36 }
  0xf4   :  { %v194_v39 = vpop.f32.mrb[11].mxu0  ;;  %606 = vmatpush3.bf16.msra.mxu1 %v603_v36  ;;  %555 = vmatprep.mubr.msk.f32.mxu1 %vm209_vm1, %v22_v37 }
  0xf5   :  { %v607_v41 = vpack.c.bf16 %v536_v38, %v194_v39 }
  0xf7   :  { %556 = vmatmul.mubr.msk.f32.gmra.mrb[4].mxu1 %vm209_vm1, %v23_v40  ;;  %608 = vmatprep.subr.bf16.mxu1 %v607_v41 }
  0xf8   :  { %610 = vmatpush3.bf16.msra.mxu1 %v607_v41  ;;  %570 = vmatprep.mubr.msk.f32.mxu1 %vm209_vm1, %v18_v18 }
  0xfb   :  { %571 = vmatmul.mubr.msk.f32.vlgmr.msra.gmra.mrb[6].mxu1 %vm209_vm1, %v19_v30 }
  0xfc   :  { %573 = vmatprep.mubr.msk.f32.mxu1 %vm209_vm1, %v20_v32 }
  0xff   :  { %574 = vmatmul.mubr.msk.f32.gmra.mrb[8].mxu1 %vm209_vm1, %v21_v35 }
 0x100   :  { %576 = vmatprep.mubr.msk.f32.mxu1 %vm209_vm1, %v22_v37 }
 0x103   :  { %577 = vmatmul.mubr.msk.f32.gmra.mrb[10].mxu1 %vm209_vm1, %v23_v40 }
 0x1c2   :  { %v551_v43 = vpop.f32.mrb[0].mxu1 }
 0x1c3   :  { %v300_v44 = vadd.f32 %v551_v43, %v458_v42  ;;  %v294_v45 = vpop.f32.mrb[1].mxu1 }
 0x1c4   :  { %v295_v46 = vadd.f32 %v458_v42, %v294_v45 }
 0x1c5   :  { %324 = vst [vmem:[#allocation2 + $0x8] sm:$0xff] %v300_v44 }
 0x1c6   :  { %323 = vst [vmem:[#allocation2] sm:$0xff] %v295_v46  ;;  %v554_v47 = vpop.f32.mrb[2].mxu1 }
 0x1c7   :  { %v310_v48 = vadd.f32 %v554_v47, %v458_v42  ;;  %v304_v49 = vpop.f32.mrb[3].mxu1 }
 0x1c8   :  { %v305_v50 = vadd.f32 %v458_v42, %v304_v49 }
 0x1c9   :  { %326 = vst [vmem:[#allocation2 + $0x18] sm:$0xff] %v310_v48 }
 0x1ca   :  { %325 = vst [vmem:[#allocation2 + $0x10] sm:$0xff] %v305_v50  ;;  %v557_v51 = vpop.f32.mrb[4].mxu1 }
 0x1cb   :  { %v320_v52 = vadd.f32 %v557_v51, %v458_v42  ;;  %v314_v53 = vpop.f32.mrb[5].mxu1 }
 0x1cc   :  { %v315_v54 = vadd.f32 %v458_v42, %v314_v53 }
 0x1cd   :  { %328 = vst [vmem:[#allocation2 + $0x28] sm:$0xff] %v320_v52 }
 0x1ce   :  { %327 = vst [vmem:[#allocation2 + $0x20] sm:$0xff] %v315_v54  ;;  %v572_v55 = vpop.f32.mrb[6].mxu1 }
 0x1cf   :  { %v401_v56 = vadd.f32 %v572_v55, %v458_v42  ;;  %v395_v57 = vpop.f32.mrb[7].mxu1 }
 0x1d0   :  { %v396_v58 = vadd.f32 %v458_v42, %v395_v57 }
 0x1d1   :  { %425 = vst [vmem:[#allocation2 + $0x38] sm:$0xff] %v401_v56 }
 0x1d2   :  { %424 = vst [vmem:[#allocation2 + $0x30] sm:$0xff] %v396_v58  ;;  %v575_v59 = vpop.f32.mrb[8].mxu1 }
 0x1d3   :  { %v411_v60 = vadd.f32 %v575_v59, %v458_v42  ;;  %v405_v61 = vpop.f32.mrb[9].mxu1 }
 0x1d4   :  { %v406_v62 = vadd.f32 %v458_v42, %v405_v61 }
 0x1d5   :  { %427 = vst [vmem:[#allocation2 + $0x48] sm:$0xff] %v411_v60 }
 0x1d6   :  { %426 = vst [vmem:[#allocation2 + $0x40] sm:$0xff] %v406_v62  ;;  %v578_v63 = vpop.f32.mrb[10].mxu1 }
 0x1d7   :  { %v421_v0 = vadd.f32 %v578_v63, %v458_v42  ;;  %v415_v1 = vpop.f32.mrb[11].mxu1 }
 0x1d8   :  { %v416_v2 = vadd.f32 %v458_v42, %v415_v1 }
 0x1d9   :  { %429 = vst [vmem:[#allocation2 + $0x58] sm:$0xff] %v421_v0 }
 0x1da   :  { %428 = vst [vmem:[#allocation2 + $0x50] sm:$0xff] %v416_v2 }
 0x1db   :  { %625 = shalt.err (!%p622_p4)
}
 0x1dc   :  { %s626_s9 = scalar_lea.hbm %s775_s4, 1536 }
 0x1dd   :  { %p627_p5 = scmp.ne.s32.totalorder %s775_s4, %s626_s9  ;;  %p630_p6 = scmp.lt.u32.totalorder %s626_s9, %s775_s4 }
 0x1df   :  { %p632_p7 = pnand %p630_p6, %p627_p5 }
 0x1e1   :  { %635 = shalt.err (!%p632_p7)
}
 0x1e2   :  { %s639_s14 = smov 128   ;;  %s640_s15 = smov 8  }
 0x1e3   :  { %441 = dma.vmem_to_hbm [thread:$0]  %s436_s3, 1536, %s775_s4, [#allocation3], %s639_s14, %s639_s14, %s640_s15  }
 0x1e4   :  { %636 = dma.done.wait [#allocation3], 1536  }
 0x1e5   :  { %637 = vsyncadd [#allocation3], 4294965760 }
 0x1e6   :  { %445 = vsyncpa [#allocation3], 1 }

</bundles_post_ra>
